<compile_context>
chip_gen: v7x
topology: tpu7x:2x2x1
jax: 0.10.0
libtpu: 0.0.40
codegen_flags: <defaults>
</compile_context>

<pallas_src>
import jax
import jax.numpy as jnp
from jax.experimental import pallas as pl
from jax.experimental.pallas import tpu as pltpu


def _round_up(x, m):
    return (x + m - 1) // m * m


def _stable_softplus(x):
    # softplus(x) = log(1 + exp(x)) == log1p(exp(-|x|)) + max(x, 0)
    return jnp.log1p(jnp.exp(-jnp.abs(x))) + jnp.maximum(x, 0.0)


def visc_penn_kernel(xT_ref, mst_ref,
                     w1t_ref, b1_ref, w2t_ref, b2_ref, w3t_ref, b3_ref,
                     out_ref):
    # xT_ref : [F_pad, TB] bf16  (features on sublanes, batch on lanes)
    # mst_ref: [8, TB]     f32   (row 0 = M, row 1 = S, row 2 = T)
    # w*t    : transposed, zero-padded bf16 weights; b* : [H, 1] f32 biases.
    xT = xT_ref[...]

    # --- MLP (MXU, bf16 inputs, f32 accumulation) ---
    h1 = jnp.maximum(
        jnp.dot(w1t_ref[...], xT, preferred_element_type=jnp.float32)
        + b1_ref[...], 0.0)                                     # [H1, TB] f32
    h2 = jnp.maximum(
        jnp.dot(w2t_ref[...], h1.astype(jnp.bfloat16),
                preferred_element_type=jnp.float32)
        + b2_ref[...], 0.0)                                     # [H2, TB] f32
    p = (jnp.dot(w3t_ref[...], h2.astype(jnp.bfloat16),
                 preferred_element_type=jnp.float32)
         + b3_ref[...])                                         # [P_pad, TB] f32

    # --- latent params: dense sigmoid/tanh over the whole block, then slice ---
    sig_p = pl.reciprocal(1.0 + jnp.exp(-p), approx=True)       # [P_pad, TB]
    tanh_p = jnp.tanh(p)                                        # [P_pad, TB]

    a1 = 3.0 * sig_p[0:1, :]
    a2 = 6.0 * sig_p[1:2, :]
    kcr = tanh_p[2:3, :]
    bM = 10.0 + 30.0 * sig_p[3:4, :]
    Mcr = tanh_p[4:5, :]
    C1 = 2.0 * sig_p[5:6, :]
    C2 = 2.0 * sig_p[6:7, :]
    Tr = tanh_p[7:8, :] - 1.0
    n = sig_p[8:9, :]
    Scr = tanh_p[9:10, :]
    bS = 30.0 * sig_p[10:11, :]

    mst = mst_ref[...]
    M = mst[0:1, :]
    S = mst[1:2, :]
    T = mst[2:3, :]

    # --- WLF temperature shift ---
    t_shift = T - Tr
    a_t = -(C1 * t_shift) * pl.reciprocal(C2 + t_shift, approx=True)

    # --- MolWeight_softplus -> eta_0 (zero-shear viscosity) ---
    M_cent = M - Mcr
    M_sc = bM * M_cent
    eta_0 = (a1 * M_cent + (kcr + a_t)
             + (a2 - a1) * _stable_softplus(M_sc) * pl.reciprocal(bM, approx=True))

    # --- ShearRate_softplus -> eta ---
    S_sc = bS * (S - Scr)
    eta = eta_0 - n * _stable_softplus(S_sc) * pl.reciprocal(bS, approx=True)

    out_ref[...] = eta                                          # lane-dense store


def visc_penn_forward(fp, PDI, M, S, T, weights, *, batch_tile=4096):
    """Fused Visc_PENN_WLF_SP forward. Returns eta of shape [B, 1] (float32)."""
    w1, b1, w2, b2, w3, b3 = weights      # math orientation: y = x @ W + b
    B, n_fp = fp.shape
    F = n_fp + 1
    l1 = w1.shape[1]
    l2 = w2.shape[1]
    P = w3.shape[1]

    # Padded dims: lane dims -> multiples of 128, sublane dims -> multiples of 8.
    F_pad = _round_up(F, 8)
    H1 = _round_up(l1, 128)
    H2 = _round_up(l2, 128)
    P_pad = _round_up(P, 8)
    B_pad = _round_up(B, 128)

    TB = _round_up(min(batch_tile, B_pad), 128)    # lane-dense batch tile
    if B_pad % TB != 0:
        B_pad = _round_up(B_pad, TB)

    # Zero-padded, transposed operands (batch on lanes). xT + weights in bf16.
    x = jnp.concatenate(
        [fp.astype(jnp.float32), PDI.reshape(B, 1).astype(jnp.float32)], axis=1)
    xT = jnp.zeros((F_pad, B_pad), jnp.bfloat16).at[:F, :B].set(
        x.T.astype(jnp.bfloat16))

    mst = jnp.zeros((8, B_pad), jnp.float32)
    mst = mst.at[0, :B].set(M.reshape(-1).astype(jnp.float32))
    mst = mst.at[1, :B].set(S.reshape(-1).astype(jnp.float32))
    mst = mst.at[2, :B].set(T.reshape(-1).astype(jnp.float32))

    w1t = jnp.zeros((H1, F_pad), jnp.bfloat16).at[:l1, :F].set(w1.T.astype(jnp.bfloat16))
    b1c = jnp.zeros((H1, 1), jnp.float32).at[:l1, 0].set(b1.astype(jnp.float32))
    w2t = jnp.zeros((H2, H1), jnp.bfloat16).at[:l2, :l1].set(w2.T.astype(jnp.bfloat16))
    b2c = jnp.zeros((H2, 1), jnp.float32).at[:l2, 0].set(b2.astype(jnp.float32))
    w3t = jnp.zeros((P_pad, H2), jnp.bfloat16).at[:P, :l2].set(w3.T.astype(jnp.bfloat16))
    b3c = jnp.zeros((P_pad, 1), jnp.float32).at[:P, 0].set(b3.astype(jnp.float32))

    grid = (B_pad // TB,)

    out = pl.pallas_call(
        visc_penn_kernel,
        out_shape=jax.ShapeDtypeStruct((1, B_pad), jnp.float32),
        grid=grid,
        in_specs=[
            pl.BlockSpec((F_pad, TB), lambda i: (0, i)),   # xT: tiled along batch
            pl.BlockSpec((8, TB), lambda i: (0, i)),       # M/S/T packed stream
            pl.BlockSpec((H1, F_pad), lambda i: (0, 0)),   # W1^T (VMEM-resident)
            pl.BlockSpec((H1, 1), lambda i: (0, 0)),       # b1
            pl.BlockSpec((H2, H1), lambda i: (0, 0)),      # W2^T
            pl.BlockSpec((H2, 1), lambda i: (0, 0)),       # b2
            pl.BlockSpec((P_pad, H2), lambda i: (0, 0)),   # W3^T
            pl.BlockSpec((P_pad, 1), lambda i: (0, 0)),    # b3
        ],
        out_specs=pl.BlockSpec((1, TB), lambda i: (0, i)),
        compiler_params=pltpu.CompilerParams(
            dimension_semantics=("parallel",),
        ),
    )(xT, mst, w1t, b1c, w2t, b2c, w3t, b3c)

    return out[0, :B].reshape(B, 1)


def visc_penn_forward_ref(fp, PDI, M, S, T, weights):
    """Pure-JAX reference replicating the torch forward (inference path)."""
    w1, b1, w2, b2, w3, b3 = weights
    x = jnp.concatenate([fp, PDI.reshape(-1, 1)], axis=1)
    h1 = jnp.maximum(x @ w1 + b1, 0.0)
    h2 = jnp.maximum(h1 @ w2 + b2, 0.0)
    p = h2 @ w3 + b3

    sig = lambda v: 1.0 / (1.0 + jnp.exp(-v))
    a1 = 3.0 * sig(p[:, 0]); a2 = 6.0 * sig(p[:, 1]); kcr = jnp.tanh(p[:, 2])
    bM = 10.0 + 30.0 * sig(p[:, 3]); Mcr = jnp.tanh(p[:, 4])
    C1 = 2.0 * sig(p[:, 5]); C2 = 2.0 * sig(p[:, 6]); Tr = jnp.tanh(p[:, 7]) - 1.0
    n = sig(p[:, 8]); Scr = jnp.tanh(p[:, 9]); bS = 30.0 * sig(p[:, 10])

    Ms, Ss, Ts = M.reshape(-1), S.reshape(-1), T.reshape(-1)
    t_shift = Ts - Tr
    a_t = -(C1 * t_shift) / (C2 + t_shift)
    M_cent = Ms - Mcr
    M_sc = bM * M_cent
    eta_0 = a1 * M_cent + (kcr + a_t) + (a2 - a1) * (jnp.log(1.0 + jnp.exp(-M_sc)) + M_sc) / bM
    S_sc = bS * (Ss - Scr)
    eta = eta_0 - n * (jnp.log(1.0 + jnp.exp(-S_sc)) + S_sc) / bS
    return eta.reshape(-1, 1)


if __name__ == "__main__":
    key = jax.random.PRNGKey(0)
    ks = jax.random.split(key, 11)

    B, n_fp = 4, 32
    l1 = l2 = 120
    P = 11
    F = n_fp + 1

    def lin_init(kw, kb, fan_in, fan_out):
        bound = float(1.0 / (fan_in ** 0.5))     # torch Linear default init range
        w = jax.random.uniform(kw, (fan_in, fan_out), jnp.float32, -bound, bound)
        b = jax.random.uniform(kb, (fan_out,), jnp.float32, -bound, bound)
        return w, b

    w1, b1 = lin_init(ks[0], ks[1], F, l1)
    w2, b2 = lin_init(ks[2], ks[3], l1, l2)
    w3, b3 = lin_init(ks[4], ks[5], l2, P)
    weights = (w1, b1, w2, b2, w3, b3)

    fp_in = jax.random.normal(ks[6], (B, n_fp), jnp.float32)
    PDI = jax.random.uniform(ks[7], (B, 1), jnp.float32, 1.0, 3.0)
    M = jax.random.uniform(ks[8], (B, 1), jnp.float32, -1.0, 1.0)   # scaled log Mw
    S = jax.random.uniform(ks[9], (B, 1), jnp.float32, -1.0, 1.0)   # scaled shear rate
    T = jax.random.uniform(ks[10], (B, 1), jnp.float32, -0.5, 1.0)  # scaled temperature

    eta = visc_penn_forward(fp_in, PDI, M, S, T, weights)
    jax.block_until_ready(eta)

    ref = visc_penn_forward_ref(fp_in, PDI, M, S, T, weights)
    assert eta.shape == (B, 1) and eta.dtype == jnp.float32
    assert bool(jnp.all(jnp.isfinite(eta)))
    # Tolerance covers bf16-stored weights/activations (native MXU bf16 pass) and
    # the approximate EUP reciprocals used for the in-kernel divides.
    assert jnp.allclose(eta, ref, atol=3e-2, rtol=3e-2), "mismatch vs reference"

    print("KERNEL_OK")
</pallas_src>

<mosaic_0001>
module attributes {stable_mosaic.version = 11 : i64} {
  func.func @visc_penn_kernel(%arg0: i32, %arg1: memref<40x128xbf16, #tpu.memory_space<vmem>>, %arg2: memref<8x128xf32, #tpu.memory_space<vmem>>, %arg3: memref<128x40xbf16, #tpu.memory_space<vmem>>, %arg4: memref<128x1xf32, #tpu.memory_space<vmem>>, %arg5: memref<128x128xbf16, #tpu.memory_space<vmem>>, %arg6: memref<128x1xf32, #tpu.memory_space<vmem>>, %arg7: memref<16x128xbf16, #tpu.memory_space<vmem>>, %arg8: memref<16x1xf32, #tpu.memory_space<vmem>>, %arg9: memref<1x128xf32, #tpu.memory_space<vmem>>) attributes {dimension_semantics = [#tpu.dimension_semantics<parallel>], iteration_bounds = array<i64: 1>, scalar_prefetch = 0 : i64, scratch_operands = 0 : i64, tpu.core_type = #tpu.core_type<tc>, window_params = [{transform_indices = @transform_0, window_bounds = array<i64: 40, 128>}, {transform_indices = @transform_1, window_bounds = array<i64: 8, 128>}, {pipeline_mode = #tpu.pipeline_mode<synchronous>, transform_indices = @transform_2, window_bounds = array<i64: 128, 40>}, {pipeline_mode = #tpu.pipeline_mode<synchronous>, transform_indices = @transform_3, window_bounds = array<i64: 128, 1>}, {pipeline_mode = #tpu.pipeline_mode<synchronous>, transform_indices = @transform_4, window_bounds = array<i64: 128, 128>}, {pipeline_mode = #tpu.pipeline_mode<synchronous>, transform_indices = @transform_5, window_bounds = array<i64: 128, 1>}, {pipeline_mode = #tpu.pipeline_mode<synchronous>, transform_indices = @transform_6, window_bounds = array<i64: 16, 128>}, {pipeline_mode = #tpu.pipeline_mode<synchronous>, transform_indices = @transform_7, window_bounds = array<i64: 16, 1>}, {transform_indices = @transform_8, window_bounds = array<i64: 1, 128>}]} {
    %c0 = arith.constant 0 : index
    %c0_0 = arith.constant 0 : index
    %0 = vector.load %arg1[%c0, %c0_0] : memref<40x128xbf16, #tpu.memory_space<vmem>>, vector<40x128xbf16>
    %c0_1 = arith.constant 0 : index
    %c0_2 = arith.constant 0 : index
    %1 = vector.load %arg3[%c0_1, %c0_2] : memref<128x40xbf16, #tpu.memory_space<vmem>>, vector<128x40xbf16>
    %cst = arith.constant dense<0.000000e+00> : vector<128x128xf32>
    %2 = tpu.matmul %1, %0, %cst {dimension_numbers = #tpu.dot_dimension_numbers<[1], [0], [0], [1], [0, 0, 1, 1], [], []>} : vector<128x40xbf16>, vector<40x128xbf16>, vector<128x128xf32> -> vector<128x128xf32>
    %c0_3 = arith.constant 0 : index
    %c0_4 = arith.constant 0 : index
    %3 = vector.load %arg4[%c0_3, %c0_4] : memref<128x1xf32, #tpu.memory_space<vmem>>, vector<128x1xf32>
    %4 = vector.broadcast %3 : vector<128x1xf32> to vector<128x128xf32>
    %5 = arith.addf %2, %4 : vector<128x128xf32>
    %cst_5 = arith.constant 0.000000e+00 : f32
    %6 = vector.broadcast %cst_5 : f32 to vector<128x128xf32>
    %7 = arith.maximumf %5, %6 : vector<128x128xf32>
    %c0_6 = arith.constant 0 : index
    %c0_7 = arith.constant 0 : index
    %8 = vector.load %arg5[%c0_6, %c0_7] : memref<128x128xbf16, #tpu.memory_space<vmem>>, vector<128x128xbf16>
    %9 = arith.truncf %7 : vector<128x128xf32> to vector<128x128xbf16>
    %cst_8 = arith.constant dense<0.000000e+00> : vector<128x128xf32>
    %10 = tpu.matmul %8, %9, %cst_8 {dimension_numbers = #tpu.dot_dimension_numbers<[1], [0], [0], [1], [0, 0, 1, 1], [], []>} : vector<128x128xbf16>, vector<128x128xbf16>, vector<128x128xf32> -> vector<128x128xf32>
    %c0_9 = arith.constant 0 : index
    %c0_10 = arith.constant 0 : index
    %11 = vector.load %arg6[%c0_9, %c0_10] : memref<128x1xf32, #tpu.memory_space<vmem>>, vector<128x1xf32>
    %12 = vector.broadcast %11 : vector<128x1xf32> to vector<128x128xf32>
    %13 = arith.addf %10, %12 : vector<128x128xf32>
    %cst_11 = arith.constant 0.000000e+00 : f32
    %14 = vector.broadcast %cst_11 : f32 to vector<128x128xf32>
    %15 = arith.maximumf %13, %14 : vector<128x128xf32>
    %c0_12 = arith.constant 0 : index
    %c0_13 = arith.constant 0 : index
    %16 = vector.load %arg7[%c0_12, %c0_13] : memref<16x128xbf16, #tpu.memory_space<vmem>>, vector<16x128xbf16>
    %17 = arith.truncf %15 : vector<128x128xf32> to vector<128x128xbf16>
    %cst_14 = arith.constant dense<0.000000e+00> : vector<16x128xf32>
    %18 = tpu.matmul %16, %17, %cst_14 {dimension_numbers = #tpu.dot_dimension_numbers<[1], [0], [0], [1], [0, 0, 1, 1], [], []>} : vector<16x128xbf16>, vector<128x128xbf16>, vector<16x128xf32> -> vector<16x128xf32>
    %c0_15 = arith.constant 0 : index
    %c0_16 = arith.constant 0 : index
    %19 = vector.load %arg8[%c0_15, %c0_16] : memref<16x1xf32, #tpu.memory_space<vmem>>, vector<16x1xf32>
    %20 = vector.broadcast %19 : vector<16x1xf32> to vector<16x128xf32>
    %21 = arith.addf %18, %20 : vector<16x128xf32>
    %cst_17 = arith.constant 0.000000e+00 : f32
    %22 = vector.broadcast %cst_17 : f32 to vector<16x128xf32>
    %23 = arith.subf %22, %21 : vector<16x128xf32>
    %24 = math.exp %23 : vector<16x128xf32>
    %cst_18 = arith.constant 1.000000e+00 : f32
    %25 = vector.broadcast %cst_18 : f32 to vector<16x128xf32>
    %26 = arith.addf %25, %24 : vector<16x128xf32>
    %27 = tpu.reciprocal %26 {approx = true} : vector<16x128xf32> -> vector<16x128xf32>
    %28 = math.tanh %21 : vector<16x128xf32>
    %29 = vector.extract_strided_slice %27 {offsets = [0, 0], sizes = [1, 128], strides = [1, 1]} : vector<16x128xf32> to vector<1x128xf32>
    %cst_19 = arith.constant 3.000000e+00 : f32
    %30 = vector.broadcast %cst_19 : f32 to vector<1x128xf32>
    %31 = arith.mulf %30, %29 : vector<1x128xf32>
    %32 = vector.extract_strided_slice %27 {offsets = [1, 0], sizes = [1, 128], strides = [1, 1]} : vector<16x128xf32> to vector<1x128xf32>
    %cst_20 = arith.constant 6.000000e+00 : f32
    %33 = vector.broadcast %cst_20 : f32 to vector<1x128xf32>
    %34 = arith.mulf %33, %32 : vector<1x128xf32>
    %35 = vector.extract_strided_slice %28 {offsets = [2, 0], sizes = [1, 128], strides = [1, 1]} : vector<16x128xf32> to vector<1x128xf32>
    %36 = vector.extract_strided_slice %27 {offsets = [3, 0], sizes = [1, 128], strides = [1, 1]} : vector<16x128xf32> to vector<1x128xf32>
    %cst_21 = arith.constant 3.000000e+01 : f32
    %37 = vector.broadcast %cst_21 : f32 to vector<1x128xf32>
    %38 = arith.mulf %37, %36 : vector<1x128xf32>
    %cst_22 = arith.constant 1.000000e+01 : f32
    %39 = vector.broadcast %cst_22 : f32 to vector<1x128xf32>
    %40 = arith.addf %39, %38 : vector<1x128xf32>
    %41 = vector.extract_strided_slice %28 {offsets = [4, 0], sizes = [1, 128], strides = [1, 1]} : vector<16x128xf32> to vector<1x128xf32>
    %42 = vector.extract_strided_slice %27 {offsets = [5, 0], sizes = [1, 128], strides = [1, 1]} : vector<16x128xf32> to vector<1x128xf32>
    %cst_23 = arith.constant 2.000000e+00 : f32
    %43 = vector.broadcast %cst_23 : f32 to vector<1x128xf32>
    %44 = arith.mulf %43, %42 : vector<1x128xf32>
    %45 = vector.extract_strided_slice %27 {offsets = [6, 0], sizes = [1, 128], strides = [1, 1]} : vector<16x128xf32> to vector<1x128xf32>
    %cst_24 = arith.constant 2.000000e+00 : f32
    %46 = vector.broadcast %cst_24 : f32 to vector<1x128xf32>
    %47 = arith.mulf %46, %45 : vector<1x128xf32>
    %48 = vector.extract_strided_slice %28 {offsets = [7, 0], sizes = [1, 128], strides = [1, 1]} : vector<16x128xf32> to vector<1x128xf32>
    %cst_25 = arith.constant 1.000000e+00 : f32
    %49 = vector.broadcast %cst_25 : f32 to vector<1x128xf32>
    %50 = arith.subf %48, %49 : vector<1x128xf32>
    %51 = vector.extract_strided_slice %27 {offsets = [8, 0], sizes = [1, 128], strides = [1, 1]} : vector<16x128xf32> to vector<1x128xf32>
    %52 = vector.extract_strided_slice %28 {offsets = [9, 0], sizes = [1, 128], strides = [1, 1]} : vector<16x128xf32> to vector<1x128xf32>
    %53 = vector.extract_strided_slice %27 {offsets = [10, 0], sizes = [1, 128], strides = [1, 1]} : vector<16x128xf32> to vector<1x128xf32>
    %cst_26 = arith.constant 3.000000e+01 : f32
    %54 = vector.broadcast %cst_26 : f32 to vector<1x128xf32>
    %55 = arith.mulf %54, %53 : vector<1x128xf32>
    %c0_27 = arith.constant 0 : index
    %c0_28 = arith.constant 0 : index
    %56 = vector.load %arg2[%c0_27, %c0_28] : memref<8x128xf32, #tpu.memory_space<vmem>>, vector<8x128xf32>
    %57 = vector.extract_strided_slice %56 {offsets = [0, 0], sizes = [1, 128], strides = [1, 1]} : vector<8x128xf32> to vector<1x128xf32>
    %58 = vector.extract_strided_slice %56 {offsets = [1, 0], sizes = [1, 128], strides = [1, 1]} : vector<8x128xf32> to vector<1x128xf32>
    %59 = vector.extract_strided_slice %56 {offsets = [2, 0], sizes = [1, 128], strides = [1, 1]} : vector<8x128xf32> to vector<1x128xf32>
    %60 = arith.subf %59, %50 : vector<1x128xf32>
    %61 = arith.mulf %44, %60 : vector<1x128xf32>
    %cst_29 = arith.constant 0.000000e+00 : f32
    %62 = vector.broadcast %cst_29 : f32 to vector<1x128xf32>
    %63 = arith.subf %62, %61 : vector<1x128xf32>
    %64 = arith.addf %47, %60 : vector<1x128xf32>
    %65 = tpu.reciprocal %64 {approx = true} : vector<1x128xf32> -> vector<1x128xf32>
    %66 = arith.mulf %63, %65 : vector<1x128xf32>
    %67 = arith.subf %57, %41 : vector<1x128xf32>
    %68 = arith.mulf %40, %67 : vector<1x128xf32>
    %69 = arith.mulf %31, %67 : vector<1x128xf32>
    %70 = arith.addf %35, %66 : vector<1x128xf32>
    %71 = arith.addf %69, %70 : vector<1x128xf32>
    %72 = arith.subf %34, %31 : vector<1x128xf32>
    %73 = math.absf %68 : vector<1x128xf32>
    %cst_30 = arith.constant 0.000000e+00 : f32
    %74 = vector.broadcast %cst_30 : f32 to vector<1x128xf32>
    %75 = arith.subf %74, %73 : vector<1x128xf32>
    %76 = math.exp %75 : vector<1x128xf32>
    %77 = math.log1p %76 : vector<1x128xf32>
    %cst_31 = arith.constant 0.000000e+00 : f32
    %78 = vector.broadcast %cst_31 : f32 to vector<1x128xf32>
    %79 = arith.maximumf %68, %78 : vector<1x128xf32>
    %80 = arith.addf %77, %79 : vector<1x128xf32>
    %81 = arith.mulf %72, %80 : vector<1x128xf32>
    %82 = tpu.reciprocal %40 {approx = true} : vector<1x128xf32> -> vector<1x128xf32>
    %83 = arith.mulf %81, %82 : vector<1x128xf32>
    %84 = arith.addf %71, %83 : vector<1x128xf32>
    %85 = arith.subf %58, %52 : vector<1x128xf32>
    %86 = arith.mulf %55, %85 : vector<1x128xf32>
    %87 = math.absf %86 : vector<1x128xf32>
    %cst_32 = arith.constant 0.000000e+00 : f32
    %88 = vector.broadcast %cst_32 : f32 to vector<1x128xf32>
    %89 = arith.subf %88, %87 : vector<1x128xf32>
    %90 = math.exp %89 : vector<1x128xf32>
    %91 = math.log1p %90 : vector<1x128xf32>
    %cst_33 = arith.constant 0.000000e+00 : f32
    %92 = vector.broadcast %cst_33 : f32 to vector<1x128xf32>
    %93 = arith.maximumf %86, %92 : vector<1x128xf32>
    %94 = arith.addf %91, %93 : vector<1x128xf32>
    %95 = arith.mulf %51, %94 : vector<1x128xf32>
    %96 = tpu.reciprocal %55 {approx = true} : vector<1x128xf32> -> vector<1x128xf32>
    %97 = arith.mulf %95, %96 : vector<1x128xf32>
    %98 = arith.subf %84, %97 : vector<1x128xf32>
    %c0_34 = arith.constant 0 : index
    %c0_35 = arith.constant 0 : index
    %99 = vector.load %arg9[%c0_34, %c0_35] : memref<1x128xf32, #tpu.memory_space<vmem>>, vector<1x128xf32>
    tpu.vector_store %arg9[%c0_34, %c0_35], %98 {strides = array<i32>} : memref<1x128xf32, #tpu.memory_space<vmem>>, vector<1x128xf32>,
    return
  }
  func.func @transform_0(%arg0: i32) -> (i32, i32) {
    %c0_i32 = arith.constant 0 : i32
    %c0_i32_0 = arith.constant 0 : i32
    return %c0_i32, %arg0 : i32, i32
  }
  func.func @transform_1(%arg0: i32) -> (i32, i32) {
    %c0_i32 = arith.constant 0 : i32
    %c0_i32_0 = arith.constant 0 : i32
    return %c0_i32, %arg0 : i32, i32
  }
  func.func @transform_2(%arg0: i32) -> (i32, i32) {
    %c0_i32 = arith.constant 0 : i32
    %c0_i32_0 = arith.constant 0 : i32
    %c0_i32_1 = arith.constant 0 : i32
    return %c0_i32, %c0_i32_0 : i32, i32
  }
  func.func @transform_3(%arg0: i32) -> (i32, i32) {
    %c0_i32 = arith.constant 0 : i32
    %c0_i32_0 = arith.constant 0 : i32
    %c0_i32_1 = arith.constant 0 : i32
    return %c0_i32, %c0_i32_0 : i32, i32
  }
  func.func @transform_4(%arg0: i32) -> (i32, i32) {
    %c0_i32 = arith.constant 0 : i32
    %c0_i32_0 = arith.constant 0 : i32
    %c0_i32_1 = arith.constant 0 : i32
    return %c0_i32, %c0_i32_0 : i32, i32
  }
  func.func @transform_5(%arg0: i32) -> (i32, i32) {
    %c0_i32 = arith.constant 0 : i32
    %c0_i32_0 = arith.constant 0 : i32
    %c0_i32_1 = arith.constant 0 : i32
    return %c0_i32, %c0_i32_0 : i32, i32
  }
  func.func @transform_6(%arg0: i32) -> (i32, i32) {
    %c0_i32 = arith.constant 0 : i32
    %c0_i32_0 = arith.constant 0 : i32
    %c0_i32_1 = arith.constant 0 : i32
    return %c0_i32, %c0_i32_0 : i32, i32
  }
  func.func @transform_7(%arg0: i32) -> (i32, i32) {
    %c0_i32 = arith.constant 0 : i32
    %c0_i32_0 = arith.constant 0 : i32
    %c0_i32_1 = arith.constant 0 : i32
    return %c0_i32, %c0_i32_0 : i32, i32
  }
  func.func @transform_8(%arg0: i32) -> (i32, i32) {
    %c0_i32 = arith.constant 0 : i32
    %c0_i32_0 = arith.constant 0 : i32
    return %c0_i32, %arg0 : i32, i32
  }
}

</mosaic_0001>

<bundles_post_ra>
// kernel: tpu_custom_call.1
= control target key start
LH: loop header
LB: loop body
LE: loop exit
PB: predicated region body
PF: predicated region fallthrough
CT: control target
= control target key end

     0   :  { %vm203_vm0 = vcmask 326656   ;;  %v1042_v4 = vmov 0   ;;  %vm228_vm1 = vcmask 1043456   ;;  %s1298_s0 = inlined_call_operand.vmem [shape: bf16[40,128], index: 0, kind: input, shape index: {}]   ;;  %s1299_s1 = inlined_call_operand.vmem [shape: f32[8,128], index: 1, kind: input, shape index: {}]   ;;  %s1300_s2 = inlined_call_operand.vmem [shape: bf16[128,40], index: 2, kind: input, shape index: {}]   ;;  %s1301_s3 = inlined_call_operand.vmem [shape: f32[128,1], index: 3, kind: input, shape index: {}]   ;;  %s1302_s4 = inlined_call_operand.vmem [shape: bf16[128,128], index: 4, kind: input, shape index: {}]   ;;  %s1303_s5 = inlined_call_operand.vmem [shape: f32[128,1], index: 5, kind: input, shape index: {}]   ;;  %s1304_s6 = inlined_call_operand.vmem [shape: bf16[16,128], index: 6, kind: input, shape index: {}]   ;;  %s1305_s7 = inlined_call_operand.vmem [shape: f32[16,1], index: 7, kind: input, shape index: {}]   ;;  %s1306_s8 = inlined_call_operand.hbm [shape: f32[1,128], index: 8, kind: output, shape index: {}]  }
   0x1   :  { %v972_v0 = vld [vmem:[%s1298_s0] sm:$0xff]   ;;  %v973_v1 = vld [vmem:[%s1298_s0 + $0x8] sm:$0xff]   ;;  %v974_v3 = vld [vmem:[%s1298_s0 + $0x10] ss:$0 sps:$4 sm:$0xff]   ;;  %970 = vset.pattern.permute.xlu0 %v1042_v4  ;;  %971 = vset.pattern.permute.xlu1 %v1042_v4 }
   0x2   :  { %891 = vmatprep.subr.bf16.mxu0 %v972_v0  ;;  %v975_v2 = vld [vmem:[%s1300_s2] sm:$0xff]   ;;  %v230_v5 = vsel %vm228_vm1, %v974_v3, 0  ;;  %v976_v7 = vld [vmem:[%s1300_s2 + $0x8] sm:$0xff]   ;;  %v54_v8 = vld [vmem:[%s1301_s3 + $0x10] sm:$0xff] }
   0x3   :  { %892 = vmatpush3.bf16.msra.mxu0 %v972_v0  ;;  %897 = vmatprep.mubr.msk.bf16.mxu0 %vm203_vm0, %v975_v2  ;;  %v52_v6 = vld [vmem:[%s1301_s3] sm:$0xff]  ;;  %v53_v9 = vld [vmem:[%s1301_s3 + $0x8] sm:$0xff]  ;;  %v977_v10 = vld [vmem:[%s1300_s2 + $0x10] sm:$0xff]  }
   0x4   :  { %893 = vmatprep.subr.bf16.mxu0 %v973_v1  ;;  %70 = vperm.xlu0 %970, %v52_v6   ;;  %v55_v11 = vld [vmem:[%s1301_s3 + $0x18] sm:$0xff]  ;;  %v56_v12 = vld [vmem:[%s1301_s3 + $0x20] sm:$0xff]  ;;  %v57_v13 = vld [vmem:[%s1301_s3 + $0x28] sm:$0xff] }
   0x5   :  { %80 = vperm.xlu1 %971, %v54_v8   ;;  %v978_v14 = vld [vmem:[%s1300_s2 + $0x18] sm:$0xff]   ;;  %v58_v15 = vld [vmem:[%s1301_s3 + $0x30] sm:$0xff]  ;;  %v979_v16 = vld [vmem:[%s1300_s2 + $0x20] sm:$0xff]  }
   0x6   :  { %v59_v17 = vld [vmem:[%s1301_s3 + $0x38] sm:$0xff]  ;;  %v60_v18 = vld [vmem:[%s1301_s3 + $0x40] sm:$0xff]  ;;  %v61_v19 = vld [vmem:[%s1301_s3 + $0x48] sm:$0xff] }
   0x7   :  { %894 = vmatpush3.bf16.msra.mxu0 %v973_v1  ;;  %v980_v20 = vld [vmem:[%s1300_s2 + $0x28] sm:$0xff]   ;;  %v62_v21 = vld [vmem:[%s1301_s3 + $0x50] sm:$0xff]  ;;  %v63_v23 = vld [vmem:[%s1301_s3 + $0x58] sm:$0xff] }
   0x8   :  { %965 = vmatprep.subr.msk.bf16.mxu0 %vm228_vm1, %v974_v3  ;;  %75 = vperm.xlu0 %970, %v53_v9   ;;  %v981_v22 = vld [vmem:[%s1300_s2 + $0x30] sm:$0xff]  }
   0x9   :  { %85 = vperm.xlu1 %971, %v55_v11  }
   0xb   :  { %896 = vmatpush3.bf16.msra.mxu0 %v230_v5 }
   0xc   :  { %90 = vperm.xlu0 %970, %v56_v12  }
   0xd   :  { %95 = vperm.xlu1 %971, %v57_v13  }
   0xe   :  { %898 = vmatmul.mubr.msk.bf16.vlgmr.msra.gmra.mrb[0].mxu0 %vm203_vm0, %v976_v7 }
   0xf   :  { %901 = vmatprep.mubr.msk.bf16.mxu0 %vm203_vm0, %v977_v10 }
  0x10   :  { %100 = vperm.xlu0 %970, %v58_v15  }
  0x11   :  { %105 = vperm.xlu1 %971, %v59_v17  }
  0x14   :  { %110 = vperm.xlu0 %970, %v60_v18  }
  0x15   :  { %115 = vperm.xlu1 %971, %v61_v19  }
  0x16   :  { %902 = vmatmul.mubr.msk.bf16.gmra.mrb[4].mxu0 %vm203_vm0, %v978_v14 }
  0x17   :  { %905 = vmatprep.mubr.msk.bf16.mxu0 %vm203_vm0, %v979_v16 }
  0x18   :  { %13 = vsyncpa [#allocation3], 0  ;;  %120 = vperm.xlu0 %970, %v62_v21   ;;  %v64_v24 = vld [vmem:[%s1301_s3 + $0x60] sm:$0xff]  ;;  %v65_v25 = vld [vmem:[%s1301_s3 + $0x68] sm:$0xff]  ;;  %vm1044_vm2 = vmmov 0  }
  0x19   :  { %125 = vperm.xlu1 %971, %v63_v23   ;;  %v982_v26 = vld [vmem:[%s1300_s2 + $0x38] sm:$0xff]   ;;  %v66_v27 = vld [vmem:[%s1301_s3 + $0x70] sm:$0xff]  ;;  %v369_v29 = vld [vmem:[%s1303_s5] sm:$0xff] }
  0x1a   :  { %v67_v28 = vld [vmem:[%s1301_s3 + $0x78] sm:$0xff]  ;;  %v370_v30 = vld [vmem:[%s1303_s5 + $0x8] sm:$0xff]  ;;  %v371_v31 = vld [vmem:[%s1303_s5 + $0x10] sm:$0xff] }
  0x1b   :  { %v372_v32 = vld [vmem:[%s1303_s5 + $0x18] sm:$0xff]  ;;  %v373_v33 = vld [vmem:[%s1303_s5 + $0x20] sm:$0xff]  ;;  %v374_v34 = vld [vmem:[%s1303_s5 + $0x28] sm:$0xff] }
  0x1c   :  { %130 = vperm.xlu0 %970, %v64_v24   ;;  %v375_v35 = vld [vmem:[%s1303_s5 + $0x30] sm:$0xff]  ;;  %v376_v36 = vld [vmem:[%s1303_s5 + $0x38] sm:$0xff]  ;;  %v377_v37 = vld [vmem:[%s1303_s5 + $0x40] sm:$0xff] }
  0x1d   :  { %135 = vperm.xlu1 %971, %v65_v25   ;;  %v378_v38 = vld [vmem:[%s1303_s5 + $0x48] sm:$0xff]  ;;  %v379_v39 = vld [vmem:[%s1303_s5 + $0x50] sm:$0xff]  ;;  %v380_v40 = vld [vmem:[%s1303_s5 + $0x58] sm:$0xff] }
  0x1e   :  { %906 = vmatmul.mubr.msk.bf16.gmra.mrb[8].mxu0 %vm203_vm0, %v980_v20  ;;  %v381_v41 = vld [vmem:[%s1303_s5 + $0x60] sm:$0xff]  ;;  %v382_v42 = vld [vmem:[%s1303_s5 + $0x68] sm:$0xff]  ;;  %v383_v43 = vld [vmem:[%s1303_s5 + $0x70] sm:$0xff] }
  0x1f   :  { %909 = vmatprep.mubr.msk.bf16.mxu0 %vm203_vm0, %v981_v22  ;;  %v384_v44 = vld [vmem:[%s1303_s5 + $0x78] sm:$0xff]  ;;  %v636_v45 = vld [vmem:[%s1305_s7] sm:$0xff]  ;;  %v637_v46 = vld [vmem:[%s1305_s7 + $0x8] sm:$0xff] }
  0x20   :  { %140 = vperm.xlu0 %970, %v66_v27   ;;  %v983_v47 = vld [vmem:[%s1302_s4] sm:$0xff]  }
  0x21   :  { %145 = vperm.xlu1 %971, %v67_v28   ;;  %929 = vmatprep.mubr.bf16.mxu1 %v983_v47 }
  0x24   :  { %387 = vperm.xlu0 %970, %v369_v29  }
  0x25   :  { %392 = vperm.xlu1 %971, %v370_v30  }
  0x26   :  { %910 = vmatmul.mubr.msk.bf16.gmra.mrb[12].mxu0 %vm203_vm0, %v982_v26 }
  0x28   :  { %397 = vperm.xlu0 %970, %v371_v31  }
  0x29   :  { %402 = vperm.xlu1 %971, %v372_v32  }
  0x2c   :  { %407 = vperm.xlu0 %970, %v373_v33  }
  0x2d   :  { %412 = vperm.xlu1 %971, %v374_v34  }
  0x30   :  { %417 = vperm.xlu0 %970, %v375_v35  }
  0x31   :  { %422 = vperm.xlu1 %971, %v376_v36  }
  0x34   :  { %427 = vperm.xlu0 %970, %v377_v37  }
  0x35   :  { %432 = vperm.xlu1 %971, %v378_v38  }
  0x38   :  { %437 = vperm.xlu0 %970, %v379_v39  }
  0x39   :  { %442 = vperm.xlu1 %971, %v380_v40  }
  0x3c   :  { %447 = vperm.xlu0 %970, %v381_v41  }
  0x3d   :  { %452 = vperm.xlu1 %971, %v382_v42  }
  0x40   :  { %457 = vperm.xlu0 %970, %v383_v43  }
  0x41   :  { %462 = vperm.xlu1 %971, %v384_v44  }
  0x44   :  { %640 = vperm.xlu0 %970, %v636_v45  }
  0x45   :  { %645 = vperm.xlu1 %971, %v637_v46  }
  0x83   :  { %v71_v48 = vpop.permute.xlu0 %70 }
  0x84   :  { %v81_v49 = vpop.permute.xlu1 %80 }
  0x87   :  { %v76_v50 = vpop.permute.xlu0 %75 }
  0x88   :  { %v86_v51 = vpop.permute.xlu1 %85 }
  0x8b   :  { %v91_v52 = vpop.permute.xlu0 %90 }
  0x8c   :  { %v96_v53 = vpop.permute.xlu1 %95 }
  0x8f   :  { %v101_v54 = vpop.permute.xlu0 %100 }
  0x90   :  { %v106_v58 = vpop.permute.xlu1 %105 }
  0x93   :  { %v111_v2 = vpop.permute.xlu0 %110 }
  0x94   :  { %v116_v6 = vpop.permute.xlu1 %115 }
  0x97   :  { %v121_v15 = vpop.permute.xlu0 %120 }
  0x98   :  { %v126_v19 = vpop.permute.xlu1 %125 }
  0x9b   :  { %v131_v27 = vpop.permute.xlu0 %130 }
  0x9c   :  { %v136_v32 = vpop.permute.xlu1 %135 }
  0x9f   :  { %v141_v39 = vpop.permute.xlu0 %140 }
  0xa0   :  { %v146_v44 = vpop.permute.xlu1 %145 }
  0xe1   :  { %v899_v55 = vpop.f32.mrb[0].mxu0 }
  0xe2   :  { %v275_v56 = vadd.f32 %v899_v55, %v81_v49  ;;  %v266_v57 = vpop.f32.mrb[1].mxu0 }
  0xe3   :  { %v267_v59 = vadd.f32 %v266_v57, %v71_v48  ;;  %v900_v60 = vpop.f32.mrb[2].mxu0  ;;  %v985_v57 = vld [vmem:[%s1302_s4 + $0x10] sm:$0xff]  }
  0xe4   :  { %v278_v61 = vadd.f32 %v900_v60, %v86_v51  ;;  %v269_v62 = vpop.f32.mrb[3].mxu0  ;;  %v331_v0 = vmax.f32 %v275_v56, 0.0  ;;  %v984_v56 = vld [vmem:[%s1302_s4 + $0x8] sm:$0xff]  }
  0xe5   :  { %v270_v63 = vadd.f32 %v269_v62, %v76_v50  ;;  %v329_v3 = vmax.f32 %v267_v59, 0.0  ;;  %v987_v59 = vld [vmem:[%s1302_s4 + $0x20] sm:$0xff]   ;;  %v988_v60 = vld [vmem:[%s1302_s4 + $0x28] sm:$0xff]   ;;  %v990_v62 = vld [vmem:[%s1302_s4 + $0x38] sm:$0xff]  }
  0xe6   :  { %v332_v1 = vmax.f32 %v278_v61, 0.0  ;;  %v989_v61 = vld [vmem:[%s1302_s4 + $0x30] sm:$0xff]  }
  0xe7   :  { %v330_v4 = vmax.f32 %v270_v63, 0.0  ;;  %v1043_v63 = vmov 0.0  }
  0xe8   :  { %v362_v5 = vpack.c.bf16 %v332_v1, %v331_v0  ;;  %945 = vmatprep.subr.bf16.mxu0 %v1043_v63  ;;  %961 = vmatprep.mubr.msk.bf16.mxu0 %vm1044_vm2, %v1043_v63  ;;  %v388_v0 = vpop.permute.xlu0 %387  ;;  %v393_v1 = vpop.permute.xlu1 %392 }
  0xe9   :  { %v903_v7 = vpop.f32.mrb[4].mxu0  ;;  %v361_v8 = vpack.c.bf16 %v330_v4, %v329_v3 }
  0xea   :  { %v291_v9 = vadd.f32 %v903_v7, %v101_v54  ;;  %v282_v10 = vpop.f32.mrb[5].mxu0 }
  0xeb   :  { %v283_v11 = vadd.f32 %v282_v10, %v91_v52  ;;  %v904_v12 = vpop.f32.mrb[6].mxu0  ;;  %913 = vmatprep.subr.bf16.mxu1 %v361_v8 }
  0xec   :  { %v294_v13 = vadd.f32 %v904_v12, %v106_v58  ;;  %v285_v14 = vpop.f32.mrb[7].mxu0  ;;  %914 = vmatpush3.bf16.msra.mxu1 %v361_v8  ;;  %v335_v17 = vmax.f32 %v291_v9, 0.0  ;;  %v986_v58 = vld [vmem:[%s1302_s4 + $0x18] sm:$0xff]   ;;  %v403_v3 = vpop.permute.xlu1 %402 }
  0xed   :  { %v286_v16 = vadd.f32 %v285_v14, %v96_v53  ;;  %915 = vmatprep.subr.bf16.mxu1 %v362_v5  ;;  %v333_v20 = vmax.f32 %v283_v11, 0.0 }
  0xee   :  { %v336_v18 = vmax.f32 %v294_v13, 0.0 }
  0xef   :  { %v334_v21 = vmax.f32 %v286_v16, 0.0 }
  0xf0   :  { %v364_v22 = vpack.c.bf16 %v336_v18, %v335_v17  ;;  %916 = vmatpush3.bf16.msra.mxu1 %v362_v5  ;;  %v413_v5 = vpop.permute.xlu1 %412 }
  0xf1   :  { %v363_v23 = vpack.c.bf16 %v334_v21, %v333_v20  ;;  %v907_v24 = vpop.f32.mrb[8].mxu0 }
  0xf2   :  { %v307_v25 = vadd.f32 %v907_v24, %v121_v15  ;;  %v298_v26 = vpop.f32.mrb[9].mxu0 }
  0xf3   :  { %v299_v28 = vadd.f32 %v298_v26, %v111_v2  ;;  %v908_v29 = vpop.f32.mrb[10].mxu0  ;;  %917 = vmatprep.subr.bf16.mxu1 %v363_v23  ;;  %v398_v2 = vpop.permute.xlu0 %397 }
  0xf4   :  { %v310_v30 = vadd.f32 %v908_v29, %v126_v19  ;;  %v301_v31 = vpop.f32.mrb[11].mxu0  ;;  %918 = vmatpush3.bf16.msra.mxu1 %v363_v23  ;;  %v339_v34 = vmax.f32 %v307_v25, 0.0  ;;  %v423_v10 = vpop.permute.xlu1 %422 }
  0xf5   :  { %v302_v33 = vadd.f32 %v301_v31, %v116_v6  ;;  %919 = vmatprep.subr.bf16.mxu1 %v364_v22  ;;  %v337_v36 = vmax.f32 %v299_v28, 0.0 }
  0xf6   :  { %v340_v35 = vmax.f32 %v310_v30, 0.0 }
  0xf7   :  { %v338_v37 = vmax.f32 %v302_v33, 0.0  ;;  %v408_v4 = vpop.permute.xlu0 %407 }
  0xf8   :  { %v366_v38 = vpack.c.bf16 %v340_v35, %v339_v34  ;;  %920 = vmatpush3.bf16.msra.mxu1 %v364_v22  ;;  %v433_v22 = vpop.permute.xlu1 %432 }
  0xf9   :  { %v365_v40 = vpack.c.bf16 %v338_v37, %v337_v36  ;;  %v911_v41 = vpop.f32.mrb[12].mxu0 }
  0xfa   :  { %v323_v42 = vadd.f32 %v911_v41, %v141_v39  ;;  %v314_v43 = vpop.f32.mrb[13].mxu0 }
  0xfb   :  { %v315_v45 = vadd.f32 %v314_v43, %v131_v27  ;;  %v912_v46 = vpop.f32.mrb[14].mxu0  ;;  %921 = vmatprep.subr.bf16.mxu1 %v365_v40  ;;  %v418_v6 = vpop.permute.xlu0 %417 }
  0xfc   :  { %v326_v47 = vadd.f32 %v912_v46, %v146_v44  ;;  %v317_v48 = vpop.f32.mrb[15].mxu0  ;;  %922 = vmatpush3.bf16.msra.mxu1 %v365_v40  ;;  %v343_v50 = vmax.f32 %v323_v42, 0.0  ;;  %v443_v35 = vpop.permute.xlu1 %442 }
  0xfd   :  { %v318_v49 = vadd.f32 %v317_v48, %v136_v32  ;;  %923 = vmatprep.subr.bf16.mxu1 %v366_v38  ;;  %v341_v52 = vmax.f32 %v315_v45, 0.0 }
  0xfe   :  { %v344_v51 = vmax.f32 %v326_v47, 0.0 }
  0xff   :  { %v342_v53 = vmax.f32 %v318_v49, 0.0  ;;  %v428_v18 = vpop.permute.xlu0 %427 }
 0x100   :  { %v368_v54 = vpack.c.bf16 %v344_v51, %v343_v50  ;;  %924 = vmatpush3.bf16.msra.mxu1 %v366_v38  ;;  %v453_v48 = vpop.permute.xlu1 %452 }
 0x101   :  { %v367_v55 = vpack.c.bf16 %v342_v53, %v341_v52 }
 0x103   :  { %925 = vmatprep.subr.bf16.mxu1 %v367_v55  ;;  %v438_v31 = vpop.permute.xlu0 %437 }
 0x104   :  { %926 = vmatpush3.bf16.msra.mxu1 %v367_v55 }
 0x105   :  { %927 = vmatprep.subr.bf16.mxu1 %v368_v54 }
 0x107   :  { %v448_v43 = vpop.permute.xlu0 %447 }
 0x108   :  { %928 = vmatpush3.bf16.msra.mxu1 %v368_v54 }
 0x10b   :  { %930 = vmatmul.mubr.bf16.vlgmr.msra.gmra.mrb[0].mxu1 %v984_v56  ;;  %v458_v55 = vpop.permute.xlu0 %457 }
 0x10c   :  { %933 = vmatprep.mubr.bf16.mxu1 %v985_v57 }
 0x113   :  { %934 = vmatmul.mubr.bf16.gmra.mrb[4].mxu1 %v986_v58 }
 0x114   :  { %937 = vmatprep.mubr.bf16.mxu1 %v987_v59 }
 0x11b   :  { %938 = vmatmul.mubr.bf16.gmra.mrb[8].mxu1 %v988_v60  ;;  %v463_v60 = vpop.permute.xlu1 %462 }
 0x11c   :  { %941 = vmatprep.mubr.bf16.mxu1 %v989_v61 }
 0x123   :  { %942 = vmatmul.mubr.bf16.gmra.mrb[12].mxu1 %v990_v62 }
 0x1de   :  { %v931_v7 = vpop.f32.mrb[0].mxu1 }
 0x1df   :  { %v556_v8 = vadd.f32 %v931_v7, %v398_v2  ;;  %v547_v9 = vpop.f32.mrb[1].mxu1 }
 0x1e0   :  { %v548_v11 = vadd.f32 %v547_v9, %v388_v0  ;;  %v932_v12 = vpop.f32.mrb[2].mxu1  ;;  %v991_v9 = vld [vmem:[%s1304_s6] sm:$0xff]  }
 0x1e1   :  { %v559_v13 = vadd.f32 %v932_v12, %v403_v3  ;;  %v550_v14 = vpop.f32.mrb[3].mxu1  ;;  %v612_v16 = vmax.f32 %v556_v8, 0.0 }
 0x1e2   :  { %v551_v15 = vadd.f32 %v550_v14, %v393_v1  ;;  %v610_v19 = vmax.f32 %v548_v11, 0.0  ;;  %v646_v14 = vpop.permute.xlu1 %645 }
 0x1e3   :  { %v613_v17 = vmax.f32 %v559_v13, 0.0 }
 0x1e4   :  { %v611_v20 = vmax.f32 %v551_v15, 0.0 }
 0x1e5   :  { %v629_v21 = vpack.c.bf16 %v613_v17, %v612_v16 }
 0x1e6   :  { %v628_v23 = vpack.c.bf16 %v611_v20, %v610_v19  ;;  %v935_v24 = vpop.f32.mrb[4].mxu1 }
 0x1e7   :  { %v572_v25 = vadd.f32 %v935_v24, %v418_v6  ;;  %v563_v26 = vpop.f32.mrb[5].mxu1 }
 0x1e8   :  { %v564_v27 = vadd.f32 %v563_v26, %v408_v4  ;;  %v936_v28 = vpop.f32.mrb[6].mxu1  ;;  %946 = vmatpush3.bf16.msra.mxu0 %v628_v23 }
 0x1e9   :  { %v575_v29 = vadd.f32 %v936_v28, %v423_v10  ;;  %v566_v30 = vpop.f32.mrb[7].mxu1  ;;  %947 = vmatprep.subr.bf16.mxu0 %v1043_v63  ;;  %v616_v33 = vmax.f32 %v572_v25, 0.0  ;;  %v641_v10 = vpop.permute.xlu0 %640  ;;  %v714_v28 = vld [vmem:[%s1299_s1] sm:$0xff]  ;;  %s1045_s1 = smov [#allocation2]  }
 0x1ea   :  { %v567_v32 = vadd.f32 %v566_v30, %v413_v5  ;;  %v614_v36 = vmax.f32 %v564_v27, 0.0  ;;  %s818_s15 = sshll.u32 %s1045_s1, 4  ;;  %s819_s15 = int_to_ptr.vmem [resolvable:$true] %s818_s15 }
 0x1eb   :  { %v617_v34 = vmax.f32 %v575_v29, 0.0  ;;  %s1018_s16 = scalar_lea.vmem %s819_s15, 16  ;;  %s1022_s2 = scalar_lea.vmem %s819_s15, 32 }
 0x1ec   :  { %v615_v37 = vmax.f32 %v567_v32, 0.0  ;;  %948 = vmatpush3.bf16.msra.mxu0 %v629_v21  ;;  %p1019_p0 = scmp.ne.s32.totalorder %s819_s15, %s1018_s16  ;;  %p1023_p1 = scmp.lt.s32.totalorder %s819_s15, %s819_s15 }
 0x1ed   :  { %v631_v38 = vpack.c.bf16 %v617_v34, %v616_v33  ;;  %949 = vmatprep.subr.bf16.mxu0 %v1043_v63  ;;  %p1024_p2 = scmp.lt.s32.totalorder %s1022_s2, %s1018_s16 }
 0x1ee   :  { %v630_v39 = vpack.c.bf16 %v615_v37, %v614_v36  ;;  %v939_v40 = vpop.f32.mrb[8].mxu1 }
 0x1ef   :  { %v588_v41 = vadd.f32 %v939_v40, %v438_v31  ;;  %v579_v42 = vpop.f32.mrb[9].mxu1  ;;  %p1025_p3 = por %p1024_p2, %p1023_p1 }
 0x1f0   :  { %v580_v44 = vadd.f32 %v579_v42, %v428_v18  ;;  %v940_v45 = vpop.f32.mrb[10].mxu1  ;;  %950 = vmatpush3.bf16.msra.mxu0 %v630_v39 }
 0x1f1   :  { %v591_v46 = vadd.f32 %v940_v45, %v443_v35  ;;  %v582_v47 = vpop.f32.mrb[11].mxu1  ;;  %951 = vmatprep.subr.bf16.mxu0 %v1043_v63  ;;  %v620_v50 = vmax.f32 %v588_v41, 0.0  ;;  %p1026_p4 = pnand %p1025_p3, %p1019_p0 }
 0x1f2   :  { %v583_v49 = vadd.f32 %v582_v47, %v433_v22  ;;  %v618_v52 = vmax.f32 %v580_v44, 0.0 }
 0x1f3   :  { %v621_v51 = vmax.f32 %v591_v46, 0.0 }
 0x1f4   :  { %v619_v53 = vmax.f32 %v583_v49, 0.0  ;;  %952 = vmatpush3.bf16.msra.mxu0 %v631_v38 }
 0x1f5   :  { %v633_v54 = vpack.c.bf16 %v621_v51, %v620_v50  ;;  %953 = vmatprep.subr.bf16.mxu0 %v1043_v63 }
 0x1f6   :  { %v632_v56 = vpack.c.bf16 %v619_v53, %v618_v52  ;;  %v943_v57 = vpop.f32.mrb[12].mxu1 }
 0x1f7   :  { %v604_v58 = vadd.f32 %v943_v57, %v458_v55  ;;  %v595_v59 = vpop.f32.mrb[13].mxu1 }
 0x1f8   :  { %v596_v61 = vadd.f32 %v595_v59, %v448_v43  ;;  %v944_v62 = vpop.f32.mrb[14].mxu1  ;;  %954 = vmatpush3.bf16.msra.mxu0 %v632_v56 }
 0x1f9   :  { %v607_v0 = vadd.f32 %v944_v62, %v463_v60  ;;  %v598_v1 = vpop.f32.mrb[15].mxu1  ;;  %955 = vmatprep.subr.bf16.mxu0 %v1043_v63  ;;  %v624_v3 = vmax.f32 %v604_v58, 0.0 }
 0x1fa   :  { %v599_v2 = vadd.f32 %v598_v1, %v453_v48  ;;  %v622_v5 = vmax.f32 %v596_v61, 0.0 }
 0x1fb   :  { %v625_v4 = vmax.f32 %v607_v0, 0.0 }
 0x1fc   :  { %v623_v6 = vmax.f32 %v599_v2, 0.0  ;;  %956 = vmatpush3.bf16.msra.mxu0 %v633_v54 }
 0x1fd   :  { %v635_v7 = vpack.c.bf16 %v625_v4, %v624_v3  ;;  %957 = vmatprep.subr.bf16.mxu0 %v1043_v63 }
 0x1fe   :  { %v634_v8 = vpack.c.bf16 %v623_v6, %v622_v5 }
 0x200   :  { %958 = vmatpush3.bf16.msra.mxu0 %v634_v8 }
 0x201   :  { %959 = vmatprep.subr.bf16.mxu0 %v1043_v63 }
 0x204   :  { %960 = vmatpush3.bf16.msra.mxu0 %v635_v7 }
 0x207   :  { %962 = vmatmul.mubr.bf16.vlgmr.msra.gmra.mrb[16].mxu0 %v991_v9 }
 0x2da   :  { %v688_v11 = vpop.f32.mrb[16].mxu0 }
 0x2db   :  { %v689_v12 = vadd.f32 %v688_v11, %v641_v10  ;;  %v963_v13 = vpop.f32.mrb[17].mxu0 }
 0x2dc   :  { %v691_v15 = vpop.f32.mrb[18].mxu0 }
 0x2dd   :  { %v695_v16 = vsub.f32 0.0, %v689_v12  ;;  %v692_v17 = vadd.f32 %v691_v15, %v646_v14  ;;  %v964_v18 = vpop.f32.mrb[19].mxu0 }
 0x2df   :  { %v697_v19 = vmul.f32 1.442695, %v695_v16  ;;  %v696_v20 = vsub.f32 0.0, %v692_v17 }
 0x2e1   :  { %992 = vpow2.f32 %v697_v19  ;;  %v699_v21 = vmul.f32 1.442695, %v696_v20 }
 0x2e3   :  { %994 = vpow2.f32 %v699_v21 }
 0x2e4   :  { %996 = vtanh.f32 %v689_v12 }
 0x2e5   :  { %998 = vtanh.f32 %v692_v17 }
 0x2eb   :  { %v993_v63 = vpop.eup %992 }
 0x2ec   :  { %v701_v22 = vadd.f32 1.0, %v993_v63 }
 0x2ed   :  { %v995_v23 = vpop.eup %994 }
 0x2ee   :  { %1000 = vrcp.f32 %v701_v22  ;;  %v702_v24 = vadd.f32 1.0, %v995_v23  ;;  %v1270_v25 = vpop.eup %996 }
 0x2ef   :  { %v733_v26 = vrot.slane %v1270_v25, 4  ;;  %v999_v27 = vpop.eup %998  ;;  %v854_v29 = vadd.f32 -1.0, %v1270_v25 }
 0x2f0   :  { %1002 = vrcp.f32 %v702_v24  ;;  %v781_v31 = vsub.f32 %v714_v28, %v999_v27 }
 0x2f1   :  { %v1277_v30 = vsub.f32 %v714_v28, %v733_v26  ;;  %v716_v34 = vrot.slane %v854_v29, 5 }
 0x2f2   :  { %v783_v39 = vrot.slane %v781_v31, 7 }
 0x2f3   :  { %v737_v38 = vrot.slane %v1277_v30, 5  ;;  %v718_v40 = vsub.f32 %v714_v28, %v716_v34 }
 0x2f5   :  { %v724_v46 = vrot.slane %v718_v40, 4  ;;  %v720_v54 = vrot.slane %v718_v40, 5 }
 0x2f8   :  { %v1001_v32 = vpop.eup %1000 }
 0x2f9   :  { %v709_v33 = vmul.f32 30.0, %v1001_v32  ;;  %v711_v43 = vmul.f32 2.0, %v1001_v32  ;;  %v707_v1 = vmul.f32 3.0, %v1001_v32  ;;  %v708_v17 = vmul.f32 6.0, %v1001_v32 }
 0x2fa   :  { %v1279_v35 = vpop.eup %1002 }
 0x2fb   :  { %v710_v36 = vadd.f32 10.0, %v709_v33  ;;  %v713_v37 = vmul.f32 30.0, %v1279_v35  ;;  %v726_v49 = vadd.f32 %v724_v46, %v711_v43  ;;  %v722_v58 = vmul.f32 %v720_v54, %v711_v43 }
 0x2fc   :  { %v750_v9 = vrot.slane %v707_v1, 7  ;;  %v740_v31 = vmul.f32 %v1277_v30, %v707_v1 }
 0x2fd   :  { %v739_v41 = vmul.f32 %v737_v38, %v710_v36  ;;  %v785_v42 = vmul.f32 %v783_v39, %v713_v37  ;;  %v723_v61 = vsub.f32 0.0, %v722_v58 }
 0x2fe   :  { %v752_v22 = vsub.f32 %v708_v17, %v750_v9 }
 0x2ff   :  { %v753_v44 = vand.u32 2147483647, %v739_v41  ;;  %v786_v45 = vand.u32 2147483647, %v785_v42  ;;  %v766_v12 = vmax.f32 %v739_v41, 0.0  ;;  %v799_v16 = vmax.f32 %v785_v42, 0.0 }
 0x301   :  { %v754_v47 = vsub.f32 0.0, %v753_v44  ;;  %v787_v48 = vsub.f32 0.0, %v786_v45 }
 0x303   :  { %v755_v50 = vmul.f32 1.442695, %v754_v47  ;;  %v788_v51 = vmul.f32 1.442695, %v787_v48 }
 0x305   :  { %1004 = vpow2.f32 %v755_v50 }
 0x306   :  { %1006 = vpow2.f32 %v788_v51 }
 0x307   :  { %1008 = vrcp.f32 %v726_v49 }
 0x30f   :  { %v1005_v52 = vpop.eup %1004 }
 0x310   :  { %v1007_v53 = vpop.eup %1006  ;;  %v757_v55 = vadd.f32 1.0, %v1005_v52  ;;  %v760_v60 = vmul.f32 -0.5, %v1005_v52  ;;  %v763_v3 = vand.u32 2147483647, %v1005_v52 }
 0x311   :  { %v1009_v56 = vpop.eup %1008  ;;  %v790_v57 = vadd.f32 1.0, %v1007_v53  ;;  %v793_v62 = vmul.f32 -0.5, %v1007_v53  ;;  %v796_v5 = vand.u32 2147483647, %v1007_v53 }
 0x312   :  { %1010 = vlog2.f32 %v757_v55  ;;  %v729_v59 = vrot.slane %v1009_v56, 1  ;;  %v761_v2 = vadd.f32 1.0, %v760_v60  ;;  %vm764_vm3 = vcmp.lt.f32.partialorder %v763_v3, 0.0004427343 }
 0x313   :  { %1012 = vlog2.f32 %v790_v57  ;;  %v794_v4 = vadd.f32 1.0, %v793_v62  ;;  %vm797_vm4 = vcmp.lt.f32.partialorder %v796_v5, 0.0004427343 }
 0x314   :  { %1014 = vrcp.f32 %v710_v36  ;;  %v731_v0 = vmul.f32 %v729_v59, %v723_v61  ;;  %v762_v11 = vmul.f32 %v1005_v52, %v761_v2 }
 0x315   :  { %1016 = vrcp.f32 %v713_v37  ;;  %v795_v14 = vmul.f32 %v1007_v53, %v794_v4 }
 0x316   :  { %v742_v7 = vrot.slane %v731_v0, 3 }
 0x318   :  { %v744_v18 = vadd.f32 %v1270_v25, %v742_v7 }
 0x31a   :  { %v746_v26 = vrot.slane %v744_v18, 2 }
 0x31c   :  { %v1011_v6 = vpop.eup %1010  ;;  %v748_v36 = vadd.f32 %v746_v26, %v740_v31 }
 0x31d   :  { %v1013_v8 = vpop.eup %1012  ;;  %v759_v10 = vmul.f32 0.6931472, %v1011_v6 }
 0x31e   :  { %v792_v13 = vmul.f32 0.6931472, %v1013_v8  ;;  %v1015_v21 = vpop.eup %1014 }
 0x31f   :  { %v765_v15 = vsel %vm764_vm3, %v762_v11, %v759_v10  ;;  %v774_v28 = vrot.slane %v1015_v21, 2  ;;  %v1017_v29 = vpop.eup %1016 }
 0x320   :  { %v767_v19 = vadd.f32 %v766_v12, %v765_v15  ;;  %v798_v20 = vsel %vm797_vm4, %v795_v14, %v792_v13  ;;  %v807_v37 = vrot.slane %v1017_v29, 2 }
 0x321   :  { %v800_v63 = vadd.f32 %v799_v16, %v798_v20 }
 0x322   :  { %v769_v23 = vrot.slane %v767_v19, 2 }
 0x323   :  { %v802_v24 = vrot.slane %v800_v63, 2 }
 0x324   :  { %v771_v27 = vmul.f32 %v769_v23, %v752_v22 }
 0x325   :  { %v804_v34 = vmul.f32 %v1279_v35, %v802_v24 }
 0x326   :  { %v776_v33 = vmul.f32 %v774_v28, %v771_v27 }
 0x327   :  { %v809_v38 = vmul.f32 %v807_v37, %v804_v34 }
 0x328   :  { %v778_v32 = vrot.slane %v776_v33, 1 }
 0x32a   :  { %v780_v25 = vadd.f32 %v778_v32, %v748_v36 }
 0x32c   :  { %v810_v39 = vsub.f32 %v780_v25, %v809_v38 }
 0x32e   :  { %811 = vst [vmem:[#allocation2] sm:$0x1] %v810_v39 }
 0x32f   :  { %1029 = shalt.err (!%p1026_p4)
}
 0x330   :  { %s1030_s3 = scalar_lea.hbm %s1306_s8, 16 }
 0x331   :  { %p1031_p5 = scmp.ne.s32.totalorder %s1306_s8, %s1030_s3  ;;  %p1034_p6 = scmp.lt.u32.totalorder %s1030_s3, %s1306_s8 }
 0x333   :  { %p1036_p7 = pnand %p1034_p6, %p1031_p5 }
 0x335   :  { %1039 = shalt.err (!%p1036_p7)
}
 0x336   :  { %821 = dma.vmem_to_hbm [thread:$0]  %s819_s15, 16, %s1306_s8, [#allocation3]  }
 0x337   :  { %1040 = dma.done.wait [#allocation3], 16  }
 0x338   :  { %1041 = vsyncadd [#allocation3], 4294967280 }
 0x339   :  { %825 = vsyncpa [#allocation3], 1 }

</bundles_post_ra>
